<compile_context>
chip_gen: v7x
topology: tpu7x:2x2x1
jax: 0.10.0
libtpu: 0.0.40
codegen_flags: <defaults>
</compile_context>

<pallas_src>
import jax
import jax.numpy as jnp
from jax import lax
from jax.experimental import pallas as pl
from jax.experimental.pallas import tpu as pltpu


def _fbn_kernel(params_ref, x_ref, o_ref):
    # params_ref: (R_BLK, 2) f32; column 0 = scale, column 1 = shift.
    #             Block index is constant along the hw grid axis, so this tiny
    #             buffer stays VMEM-resident while lane tiles of a row block stream.
    # x_ref/o_ref: (R_BLK, HW_BLK) activation tile, lane-dense on H*W.
    p = params_ref[...]
    scale = p[:, 0:1]                      # (R_BLK, 1) -> lane-broadcast
    shift = p[:, 1:2]
    x = x_ref[...].astype(jnp.float32)     # f32 compute: required for bf16 inputs on v5e
    o_ref[...] = (x * scale + shift).astype(o_ref.dtype)


def frozen_batch_norm_2d(
    x, weight, bias, running_mean, running_var, *, eps=1e-5,
    tile_bytes_target=2 * 1024 * 1024,
):
    """FrozenBatchNorm2d forward: y = x * (w * rsqrt(rv + eps)) + (b - rm * scale)."""
    N, C, H, W = x.shape
    rows, hw = N * C, H * W
    itemsize = x.dtype.itemsize

    # Per-channel affine, precomputed once in f32.
    scale = weight.astype(jnp.float32) * lax.rsqrt(
        running_var.astype(jnp.float32) + jnp.float32(eps)
    )
    shift = bias.astype(jnp.float32) - running_mean.astype(jnp.float32) * scale

    # Pack [scale | shift] per (n, c) row of the flattened [N*C, H*W] view
    # (row = n*C + c): one small side buffer, one DMA instead of two.
    params = jnp.stack(
        [jnp.tile(scale, (N,)), jnp.tile(shift, (N,))], axis=-1
    )  # (rows, 2) f32

    x2 = x.reshape(rows, hw)

    # ---- Tile sizing -------------------------------------------------------
    # Prefer wide lane blocks (v5e has a single vst slot; lane-dense stores are
    # the big lever), then fill the per-buffer byte budget with rows.
    min_rows = min(rows, 8)
    max_lanes = max(1, tile_bytes_target // (min_rows * itemsize))
    if hw <= max_lanes:
        hw_blk = hw                                   # full extent: legal for any hw (incl. <128)
    else:
        hw_blk = max(128, (max_lanes // 128) * 128)   # multiple of 128; ragged tail is masked

    r_blk = max(1, tile_bytes_target // (hw_blk * itemsize))
    if r_blk >= rows:
        r_blk = rows                                  # full extent (legal even if not %8)
    else:
        r_blk = max(8, (r_blk // 8) * 8)              # multiple of 8 sublanes

    grid = (pl.cdiv(rows, r_blk), pl.cdiv(hw, hw_blk))

    # VMEM budget from the actual tile math: in + out double-buffered plus the
    # resident params buffer, with 2x headroom for Mosaic internal scratch.
    tile_bytes = r_blk * hw_blk * itemsize
    footprint = 2 * tile_bytes * 2 + 2 * (r_blk * 2 * 4)
    vmem_limit = min(max(2 * footprint, 16 << 20), 48 << 20)

    # TODO(synk): for late DETR/ResNet stages with tiny H*W (<128), a channels-last
    # [N*H*W, C] layout would be fully lane-dense; kept NCHW to match the module.
    out2 = pl.pallas_call(
        _fbn_kernel,
        out_shape=jax.ShapeDtypeStruct((rows, hw), x.dtype),
        grid=grid,
        in_specs=[
            pl.BlockSpec((r_blk, 2), lambda i, j: (i, 0)),        # resident across hw axis
            pl.BlockSpec((r_blk, hw_blk), lambda i, j: (i, j)),
        ],
        out_specs=pl.BlockSpec((r_blk, hw_blk), lambda i, j: (i, j)),
        compiler_params=pltpu.CompilerParams(
            dimension_semantics=("parallel", "parallel"),
            vmem_limit_bytes=vmem_limit,
        ),
        cost_estimate=pl.CostEstimate(
            flops=2 * x.size,
            transcendentals=0,
            bytes_accessed=2 * x.size * itemsize + rows * 2 * 4,
        ),
    )(params, x2)

    return out2.reshape(N, C, H, W)


def _reference(x, weight, bias, running_mean, running_var, eps=1e-5):
    w = weight.reshape(1, -1, 1, 1).astype(jnp.float32)
    b = bias.reshape(1, -1, 1, 1).astype(jnp.float32)
    rv = running_var.reshape(1, -1, 1, 1).astype(jnp.float32)
    rm = running_mean.reshape(1, -1, 1, 1).astype(jnp.float32)
    scale = w * lax.rsqrt(rv + eps)
    return (x.astype(jnp.float32) * scale + (b - rm * scale)).astype(x.dtype)


if __name__ == "__main__":
    key = jax.random.PRNGKey(0)
    kx, kw, kb, km, kv, kx2 = jax.random.split(key, 6)

    # --- small-shape check (module-consistent: batch=2, channels=4, spatial=16)
    N, C, H, W = 2, 4, 16, 16
    x = jax.random.normal(kx, (N, C, H, W), dtype=jnp.float32)

    # Module __init__ gives identity params; perturb deterministically so the
    # math is exercised.
    weight = jnp.ones((C,), jnp.float32) + 0.1 * jax.random.normal(kw, (C,), jnp.float32)
    bias = jnp.zeros((C,), jnp.float32) + 0.1 * jax.random.normal(kb, (C,), jnp.float32)
    running_mean = jnp.zeros((C,), jnp.float32) + 0.1 * jax.random.normal(km, (C,), jnp.float32)
    running_var = jnp.ones((C,), jnp.float32) + 0.1 * jnp.abs(
        jax.random.normal(kv, (C,), jnp.float32)
    )

    out = jax.block_until_ready(
        frozen_batch_norm_2d(x, weight, bias, running_mean, running_var)
    )
    ref = _reference(x, weight, bias, running_mean, running_var)
    assert out.shape == x.shape and out.dtype == x.dtype
    assert jnp.allclose(out, ref, atol=1e-5, rtol=1e-5)

    # --- bf16 path (DETR inference): kernel computes in f32, stores bf16.
    x_bf16 = x.astype(jnp.bfloat16)
    out_bf16 = jax.block_until_ready(
        frozen_batch_norm_2d(x_bf16, weight, bias, running_mean, running_var)
    )
    ref_bf16 = _reference(x_bf16, weight, bias, running_mean, running_var)
    assert out_bf16.dtype == jnp.bfloat16
    assert jnp.allclose(
        out_bf16.astype(jnp.float32), ref_bf16.astype(jnp.float32), atol=2e-2, rtol=2e-2
    )

    # --- tiled-grid check: tiny tile budget forces a multi-block (rows x hw)
    # grid with a ragged lane tail and resident params (same code path that
    # handles full-size DETR feature maps).
    N2, C2, H2, W2 = 2, 16, 24, 20  # rows=32, hw=480 (3 full 128-lane tiles + tail)
    x_big = jax.random.normal(kx2, (N2, C2, H2, W2), dtype=jnp.float32)
    w2 = jnp.linspace(0.5, 1.5, C2, dtype=jnp.float32)
    b2 = jnp.linspace(-0.3, 0.3, C2, dtype=jnp.float32)
    rm2 = jnp.linspace(-0.2, 0.2, C2, dtype=jnp.float32)
    rv2 = jnp.linspace(0.5, 2.0, C2, dtype=jnp.float32)
    out_big = jax.block_until_ready(
        frozen_batch_norm_2d(x_big, w2, b2, rm2, rv2, tile_bytes_target=4096)
    )
    ref_big = _reference(x_big, w2, b2, rm2, rv2)
    assert jnp.allclose(out_big, ref_big, atol=1e-5, rtol=1e-5)

    print("KERNEL_OK")
</pallas_src>

<mosaic_0001>
module attributes {stable_mosaic.version = 11 : i64} {
  func.func @_fbn_kernel(%arg0: i32, %arg1: i32, %arg2: memref<8x2xf32, #tpu.memory_space<vmem>>, %arg3: memref<8x256xf32, #tpu.memory_space<vmem>>, %arg4: memref<8x256xf32, #tpu.memory_space<vmem>>) attributes {dimension_semantics = [#tpu.dimension_semantics<parallel>, #tpu.dimension_semantics<parallel>], iteration_bounds = array<i64: 1, 1>, scalar_prefetch = 0 : i64, scratch_operands = 0 : i64, tpu.core_type = #tpu.core_type<tc>, window_params = [{transform_indices = @transform_0, window_bounds = array<i64: 8, 2>}, {transform_indices = @transform_1, window_bounds = array<i64: 8, 256>}, {transform_indices = @transform_2, window_bounds = array<i64: 8, 256>}]} {
    %c0 = arith.constant 0 : index
    %c0_0 = arith.constant 0 : index
    %0 = vector.load %arg2[%c0, %c0_0] : memref<8x2xf32, #tpu.memory_space<vmem>>, vector<8x2xf32>
    %1 = vector.extract_strided_slice %0 {offsets = [0, 0], sizes = [8, 1], strides = [1, 1]} : vector<8x2xf32> to vector<8x1xf32>
    %2 = vector.extract_strided_slice %0 {offsets = [0, 1], sizes = [8, 1], strides = [1, 1]} : vector<8x2xf32> to vector<8x1xf32>
    %c0_1 = arith.constant 0 : index
    %c0_2 = arith.constant 0 : index
    %3 = vector.load %arg3[%c0_1, %c0_2] : memref<8x256xf32, #tpu.memory_space<vmem>>, vector<8x256xf32>
    %4 = vector.broadcast %1 : vector<8x1xf32> to vector<8x256xf32>
    %5 = arith.mulf %3, %4 : vector<8x256xf32>
    %6 = vector.broadcast %2 : vector<8x1xf32> to vector<8x256xf32>
    %7 = arith.addf %5, %6 : vector<8x256xf32>
    %c0_3 = arith.constant 0 : index
    %c0_4 = arith.constant 0 : index
    %8 = vector.load %arg4[%c0_3, %c0_4] : memref<8x256xf32, #tpu.memory_space<vmem>>, vector<8x256xf32>
    tpu.vector_store %arg4[%c0_3, %c0_4], %7 {strides = array<i32>} : memref<8x256xf32, #tpu.memory_space<vmem>>, vector<8x256xf32>,
    return
  }
  func.func @transform_0(%arg0: i32, %arg1: i32) -> (i32, i32) {
    %c0_i32 = arith.constant 0 : i32
    %c0_i32_0 = arith.constant 0 : i32
    return %arg0, %c0_i32 : i32, i32
  }
  func.func @transform_1(%arg0: i32, %arg1: i32) -> (i32, i32) {
    %c0_i32 = arith.constant 0 : i32
    return %arg0, %arg1 : i32, i32
  }
  func.func @transform_2(%arg0: i32, %arg1: i32) -> (i32, i32) {
    %c0_i32 = arith.constant 0 : i32
    return %arg0, %arg1 : i32, i32
  }
}

</mosaic_0001>

<bundles_post_ra>
// kernel: tpu_custom_call.1
= control target key start
LH: loop header
LB: loop body
LE: loop exit
PB: predicated region body
PF: predicated region fallthrough
CT: control target
= control target key end

     0   :  { %7 = vsyncpa [#allocation3], 0  ;;  %s157_s0 = inlined_call_operand.vmem [shape: f32[8,2], index: 0, kind: input, shape index: {}]   ;;  %s158_s1 = inlined_call_operand.hbm [shape: f32[8,256], index: 1, kind: input, shape index: {}]   ;;  %s159_s2 = inlined_call_operand.hbm [shape: f32[8,256], index: 2, kind: output, shape index: {}]  }
   0x1   :  { %8 = vsyncpa [#allocation4], 0  ;;  %s111_s9 = smov [#allocation2]   ;;  %s63_s13 = scalar_lea.hbm %s158_s1, 256 }
   0x2   :  { %s17_s10 = sshll.u32 %s111_s9, 4  ;;  %p64_p0 = scmp.ne.s32.totalorder %s158_s1, %s63_s13  ;;  %s18_s10 = int_to_ptr.vmem [resolvable:$true] %s17_s10 }
   0x3   :  { %p67_p1 = scmp.lt.u32.totalorder %s63_s13, %s158_s1 }
   0x5   :  { %p69_p2 = pnand %p67_p1, %p64_p0 }
   0x7   :  { %72 = shalt.err (!%p69_p2)
}
   0x8   :  { %s73_s18 = scalar_lea.vmem %s18_s10, 256  ;;  %p78_p4 = scmp.lt.s32.totalorder %s18_s10, %s18_s10 }
   0x9   :  { %p74_p3 = scmp.ne.s32.totalorder %s18_s10, %s73_s18  ;;  %p79_p5 = scmp.lt.s32.totalorder %s73_s18, %s73_s18 }
   0xb   :  { %p80_p6 = por %p79_p5, %p78_p4 }
   0xd   :  { %p81_p7 = pnand %p80_p6, %p74_p3 }
   0xf   :  { %84 = shalt.err (!%p81_p7)
}
  0x10   :  { %20 = dma.hbm_to_vmem [thread:$0]  %s158_s1, 256, %s18_s10, [#allocation3]  }
  0x11   :  { %107 = dma.done.wait [#allocation3], 256  }
  0x12   :  { %108 = vsyncadd [#allocation3], 4294967040  ;;  %v112_v0 = vmov 0   ;;  %v24_v1 = vld [vmem:[%s157_s0] sm:$0xff]  ;;  %v113_v2 = vmov 1   ;;  %v26_v5 = vld [vmem:[#allocation2 + $0x8] sm:$0xff] }
  0x13   :  { %61 = vset.pattern.permute.xlu0 %v112_v0  ;;  %v25_v4 = vld [vmem:[#allocation2] sm:$0xff]  ;;  %s114_s23 = smov [#allocation5]  }
  0x14   :  { %29 = vperm.xlu0 %61, %v24_v1   ;;  %s48_s24 = sshll.u32 %s114_s23, 4  ;;  %s49_s24 = int_to_ptr.vmem [resolvable:$true] %s48_s24 }
  0x15   :  { %s85_s1 = scalar_lea.vmem %s49_s24, 256  ;;  %p90_p9 = scmp.lt.s32.totalorder %s49_s24, %s49_s24 }
  0x16   :  { %p86_p8 = scmp.ne.s32.totalorder %s49_s24, %s85_s1  ;;  %p91_p10 = scmp.lt.s32.totalorder %s85_s1, %s85_s1 }
  0x18   :  { %62 = vset.pattern.permute.xlu0 %v113_v2  ;;  %p92_p11 = por %p91_p10, %p90_p9 }
  0x19   :  { %35 = vperm.xlu0 %62, %v24_v1  }
  0x1a   :  { %p93_p12 = pnand %p92_p11, %p86_p8 }
  0x93   :  { %v30_v3 = vpop.permute.xlu0 %29 }
  0x94   :  { %v32_v6 = vmul.f32 %v30_v3, %v25_v4  ;;  %v33_v7 = vmul.f32 %v30_v3, %v26_v5 }
  0x98   :  { %v36_v8 = vpop.permute.xlu0 %35 }
  0x99   :  { %v38_v9 = vadd.f32 %v36_v8, %v32_v6  ;;  %v39_v10 = vadd.f32 %v36_v8, %v33_v7 }
  0x9b   :  { %40 = vst [vmem:[#allocation5] sm:$0xff] %v38_v9  ;;  %41 = vst [vmem:[#allocation5 + $0x8] sm:$0xff] %v39_v10 }
  0x9c   :  { %96 = shalt.err (!%p93_p12)
}
  0x9d   :  { %s97_s26 = scalar_lea.hbm %s159_s2, 256 }
  0x9e   :  { %p98_p13 = scmp.ne.s32.totalorder %s159_s2, %s97_s26  ;;  %p101_p0 = scmp.lt.u32.totalorder %s97_s26, %s159_s2 }
  0xa0   :  { %p103_p1 = pnand %p101_p0, %p98_p13 }
  0xa2   :  { %106 = shalt.err (!%p103_p1)
}
  0xa3   :  { %51 = dma.vmem_to_hbm [thread:$0]  %s49_s24, 256, %s159_s2, [#allocation4]  }
  0xa4   :  { %109 = dma.done.wait [#allocation4], 256  }
  0xa5   :  { %110 = vsyncadd [#allocation4], 4294967040 }
  0xa6   :  { %55 = vsyncpa [#allocation3], 1 }
  0xa7   :  { %56 = vsyncpa [#allocation4], 1 }

</bundles_post_ra>
